<compile_context>
chip_gen: v7x
topology: tpu7x:2x2x1
jax: 0.10.0
libtpu: 0.0.40
codegen_flags: <defaults>
</compile_context>

<pallas_src>
import functools

import jax
import jax.numpy as jnp
from jax.experimental import pallas as pl
from jax.experimental.pallas import tpu as pltpu

K = 128
EDGE_TYPES = 1024
PI = 3.14159          # matches the literal in the torch.jit.script gaussian()
A = (2.0 * PI) ** 0.5


def _round_up(x, m):
    return ((x + m - 1) // m) * m


def _effective_tm(M, tm):
    """Pick the row-tile size: keep >=2 balanced blocks when possible (v7x dual-TC),
    honoring the sublane (multiple-of-8 or full-extent) constraint."""
    if M <= 1024:
        return M                                    # single full-extent block
    if M <= 2 * tm:
        return min(tm, _round_up(pl.cdiv(M, 2), 512))   # 2 balanced blocks
    return tm


def _gaussian_kernel(y_ref, p_ref, out_ref, *, exp_dtype):
    # y_ref: [TM, 1]; p_ref: [3, K] = (mean, c2, coef); out_ref: [TM, K].
    y = y_ref[...]                      # [TM, 1]
    mean = p_ref[0:1, :]                # [1, K]
    c2 = p_ref[1:2, :]                  # [1, K]  = -0.5 / std^2
    coef = p_ref[2:3, :]                # [1, K]  = 1 / (sqrt(2*pi) * std)
    d = y - mean                        # broadcast -> [TM, K]
    arg = d * d * c2                    # [TM, K]
    e = jnp.exp(arg.astype(exp_dtype)).astype(jnp.float32)
    out_ref[...] = (e * coef).astype(out_ref.dtype)


@functools.partial(jax.jit, static_argnames=("tm", "out_dtype", "exp_dtype"))
def gaussian_layer_pallas(x, edge_type, means_w, stds_w, mul_w, bias_w,
                          *, tm=8192, out_dtype=jnp.float32,
                          exp_dtype=jnp.float32):
    """x: [B, N, N] float, edge_type: [B, N, N] int32 -> [B, N, N, K]."""
    B, N, _ = x.shape
    M = B * N * N

    # Glue (plain JAX): tiny data-dependent embedding gathers + affine, fused
    # by XLA into a single [M, 1] input stream for the kernel (~1/128 of the
    # output traffic -> negligible).
    mul = mul_w[edge_type, 0].astype(jnp.float32)     # [B, N, N]
    bias = bias_w[edge_type, 0].astype(jnp.float32)   # [B, N, N]
    y = (mul * x.astype(jnp.float32) + bias).reshape(M, 1)

    # Hoisted + folded per-lane parameters, packed into ONE [3, K] block.
    mean = means_w.reshape(1, K).astype(jnp.float32)
    std = jnp.abs(stds_w.reshape(1, K).astype(jnp.float32)) + 1e-5
    inv_std = 1.0 / std
    coef = inv_std / A
    c2 = -0.5 * inv_std * inv_std
    params = jnp.concatenate([mean, c2, coef], axis=0)   # [3, K]

    tm_eff = _effective_tm(M, tm)
    grid_m = pl.cdiv(M, tm_eff)   # ragged last block handled by Pallas:
                                  # OOB reads unspecified, OOB writes discarded.

    out = pl.pallas_call(
        functools.partial(_gaussian_kernel, exp_dtype=exp_dtype),
        out_shape=jax.ShapeDtypeStruct((M, K), out_dtype),
        grid_spec=pltpu.PrefetchScalarGridSpec(
            num_scalar_prefetch=0,
            grid=(grid_m,),
            in_specs=[pl.BlockSpec((tm_eff, 1), lambda i: (i, 0)),
                      pl.BlockSpec((3, K), lambda i: (0, 0))],
            out_specs=pl.BlockSpec((tm_eff, K), lambda i: (i, 0)),
        ),
        # Budget: double-buffered (lane-padded input + output) ~= tm * 2 KiB
        # at f32 (16 MiB at tm=8192).  32 MiB covers v5e's 16 MiB default
        # scoped limit and leaves headroom under v7x's 64 MiB physical VMEM.
        compiler_params=pltpu.CompilerParams(
            dimension_semantics=("parallel",),
            vmem_limit_bytes=32 * 1024 * 1024),
    )(y, params)

    return out.reshape(B, N, N, K)


def gaussian_layer_ref(x, edge_type, means_w, stds_w, mul_w, bias_w):
    """Pure-JAX reference mirroring the PyTorch forward."""
    mul = mul_w[edge_type].astype(x.dtype)       # [B,N,N,1]
    bias = bias_w[edge_type].astype(x.dtype)     # [B,N,N,1]
    y = mul * x[..., None] + bias                # [B,N,N,1]
    y = jnp.broadcast_to(y, y.shape[:-1] + (K,)).astype(jnp.float32)
    mean = means_w.reshape(-1).astype(jnp.float32)
    std = jnp.abs(stds_w.reshape(-1).astype(jnp.float32)) + 1e-5
    return (jnp.exp(-0.5 * ((y - mean) / std) ** 2) / (A * std)).astype(jnp.float32)


if __name__ == "__main__":
    key = jax.random.PRNGKey(0)
    k_means, k_stds, k_x, k_et, k_x2, k_et2 = jax.random.split(key, 6)

    # Deterministic "init": means/stds ~ U(0,3); mul = 1; bias = 0 (per __init__).
    means_w = jax.random.uniform(k_means, (1, K), jnp.float32, 0.0, 3.0)
    stds_w = jax.random.uniform(k_stds, (1, K), jnp.float32, 0.0, 3.0)
    mul_w = jnp.ones((EDGE_TYPES, 1), jnp.float32)
    bias_w = jnp.zeros((EDGE_TYPES, 1), jnp.float32)

    # Test 1: small shapes (M=128 -> single full-extent block).
    B, N = 2, 8
    x = jax.random.uniform(k_x, (B, N, N), jnp.float32, 0.0, 10.0)
    edge_type = jax.random.randint(k_et, (B, N, N), 0, EDGE_TYPES, jnp.int32)

    out = gaussian_layer_pallas(x, edge_type, means_w, stds_w, mul_w, bias_w)
    out = jax.block_until_ready(out)
    ref = gaussian_layer_ref(x, edge_type, means_w, stds_w, mul_w, bias_w)
    assert out.shape == (B, N, N, K) and out.dtype == jnp.float32
    assert jnp.allclose(out, ref, rtol=1e-5, atol=1e-6), "mismatch vs reference (small)"

    # Test 2: M=4608 -> 2 balanced blocks of 2560 with a ragged tail (no pad/slice).
    B2, N2 = 2, 48
    x2 = jax.random.uniform(k_x2, (B2, N2, N2), jnp.float32, 0.0, 10.0)
    edge_type2 = jax.random.randint(k_et2, (B2, N2, N2), 0, EDGE_TYPES, jnp.int32)

    out2 = gaussian_layer_pallas(x2, edge_type2, means_w, stds_w, mul_w, bias_w)
    out2 = jax.block_until_ready(out2)
    ref2 = gaussian_layer_ref(x2, edge_type2, means_w, stds_w, mul_w, bias_w)
    assert out2.shape == (B2, N2, N2, K) and out2.dtype == jnp.float32
    assert jnp.allclose(out2, ref2, rtol=1e-5, atol=1e-6), "mismatch vs reference (multi-tile)"

    # Test 3: recommended production setting — bf16 output (halves writeback).
    # TODO(synk): on v6e/v7x also pass exp_dtype=jnp.bfloat16 if a profile shows
    # the single EUP unit binding after the bf16-output switch (not on v5e).
    out_bf16 = gaussian_layer_pallas(x2, edge_type2, means_w, stds_w, mul_w, bias_w,
                                     out_dtype=jnp.bfloat16)
    out_bf16 = jax.block_until_ready(out_bf16)
    assert out_bf16.dtype == jnp.bfloat16
    assert jnp.allclose(out_bf16.astype(jnp.float32), ref2, rtol=2e-2, atol=2e-3), \
        "mismatch vs reference (bf16 output)"

    print("KERNEL_OK")
</pallas_src>

<mosaic_0001>
module attributes {stable_mosaic.version = 11 : i64} {
  func.func @_gaussian_kernel(%arg0: i32, %arg1: memref<128x1xf32, #tpu.memory_space<vmem>>, %arg2: memref<3x128xf32, #tpu.memory_space<vmem>>, %arg3: memref<128x128xf32, #tpu.memory_space<vmem>>) attributes {dimension_semantics = [#tpu.dimension_semantics<parallel>], iteration_bounds = array<i64: 1>, scalar_prefetch = 0 : i64, scratch_operands = 0 : i64, tpu.core_type = #tpu.core_type<tc>, window_params = [{transform_indices = @transform_0, window_bounds = array<i64: 128, 1>}, {pipeline_mode = #tpu.pipeline_mode<synchronous>, transform_indices = @transform_1, window_bounds = array<i64: 3, 128>}, {transform_indices = @transform_2, window_bounds = array<i64: 128, 128>}]} {
    %c0 = arith.constant 0 : index
    %c0_0 = arith.constant 0 : index
    %0 = vector.load %arg1[%c0, %c0_0] : memref<128x1xf32, #tpu.memory_space<vmem>>, vector<128x1xf32>
    %c0_1 = arith.constant 0 : index
    %c0_2 = arith.constant 0 : index
    %1 = vector.load %arg2[%c0_1, %c0_2] : memref<3x128xf32, #tpu.memory_space<vmem>>, vector<1x128xf32>
    %c1 = arith.constant 1 : index
    %c0_3 = arith.constant 0 : index
    %2 = vector.load %arg2[%c1, %c0_3] : memref<3x128xf32, #tpu.memory_space<vmem>>, vector<1x128xf32>
    %c2 = arith.constant 2 : index
    %c0_4 = arith.constant 0 : index
    %3 = vector.load %arg2[%c2, %c0_4] : memref<3x128xf32, #tpu.memory_space<vmem>>, vector<1x128xf32>
    %4 = vector.broadcast %0 : vector<128x1xf32> to vector<128x128xf32>
    %5 = vector.broadcast %1 : vector<1x128xf32> to vector<128x128xf32>
    %6 = arith.subf %4, %5 : vector<128x128xf32>
    %7 = arith.mulf %6, %6 : vector<128x128xf32>
    %8 = vector.broadcast %2 : vector<1x128xf32> to vector<128x128xf32>
    %9 = arith.mulf %7, %8 : vector<128x128xf32>
    %10 = math.exp %9 : vector<128x128xf32>
    %11 = vector.broadcast %3 : vector<1x128xf32> to vector<128x128xf32>
    %12 = arith.mulf %10, %11 : vector<128x128xf32>
    %c0_5 = arith.constant 0 : index
    %c0_6 = arith.constant 0 : index
    %13 = vector.load %arg3[%c0_5, %c0_6] : memref<128x128xf32, #tpu.memory_space<vmem>>, vector<128x128xf32>
    tpu.vector_store %arg3[%c0_5, %c0_6], %12 {strides = array<i32>} : memref<128x128xf32, #tpu.memory_space<vmem>>, vector<128x128xf32>,
    return
  }
  func.func @transform_0(%arg0: i32) -> (i32, i32) {
    %c0_i32 = arith.constant 0 : i32
    %c0_i32_0 = arith.constant 0 : i32
    return %arg0, %c0_i32 : i32, i32
  }
  func.func @transform_1(%arg0: i32) -> (i32, i32) {
    %c0_i32 = arith.constant 0 : i32
    %c0_i32_0 = arith.constant 0 : i32
    %c0_i32_1 = arith.constant 0 : i32
    return %c0_i32, %c0_i32_0 : i32, i32
  }
  func.func @transform_2(%arg0: i32) -> (i32, i32) {
    %c0_i32 = arith.constant 0 : i32
    %c0_i32_0 = arith.constant 0 : i32
    return %arg0, %c0_i32 : i32, i32
  }
}

</mosaic_0001>

<bundles_post_ra>
// kernel: gaussian_layer_pallas.1
= control target key start
LH: loop header
LB: loop body
LE: loop exit
PB: predicated region body
PF: predicated region fallthrough
CT: control target
= control target key end

     0   :  { %v316_v2 = vmov 0   ;;  %s458_s0 = inlined_call_operand.vmem [shape: f32[128,1], index: 0, kind: input, shape index: {}]   ;;  %s459_s1 = inlined_call_operand.vmem [shape: f32[3,128], index: 1, kind: input, shape index: {}]   ;;  %s460_s2 = inlined_call_operand.hbm [shape: f32[128,128], index: 2, kind: output, shape index: {}]  }
   0x1   :  { %v14_v0 = vld [vmem:[%s458_s0 + $0x10] sm:$0xff]  ;;  %v12_v1 = vld [vmem:[%s458_s0] sm:$0xff]  ;;  %259 = vset.pattern.permute.xlu1 %v316_v2  ;;  %258 = vset.pattern.permute.xlu0 %v316_v2  ;;  %v15_v3 = vld [vmem:[%s458_s0 + $0x18] sm:$0xff] }
   0x2   :  { %43 = vperm.xlu1 %259, %v14_v0   ;;  %33 = vperm.xlu0 %258, %v12_v1   ;;  %v13_v4 = vld [vmem:[%s458_s0 + $0x8] sm:$0xff] }
   0x6   :  { %48 = vperm.xlu1 %259, %v15_v3   ;;  %38 = vperm.xlu0 %258, %v13_v4  }
   0x7   :  { %7 = vsyncpa [#allocation3], 0  ;;  %v17_v5 = vld [vmem:[%s458_s0 + $0x28] sm:$0xff]  ;;  %v16_v6 = vld [vmem:[%s458_s0 + $0x20] sm:$0xff] }
   0x8   :  { %v19_v7 = vld [vmem:[%s458_s0 + $0x38] sm:$0xff]  ;;  %v18_v8 = vld [vmem:[%s458_s0 + $0x30] sm:$0xff]  ;;  %v21_v9 = vld [vmem:[%s458_s0 + $0x48] sm:$0xff] }
   0x9   :  { %v20_v10 = vld [vmem:[%s458_s0 + $0x40] sm:$0xff]  ;;  %v23_v11 = vld [vmem:[%s458_s0 + $0x58] sm:$0xff]  ;;  %v22_v12 = vld [vmem:[%s458_s0 + $0x50] sm:$0xff] }
   0xa   :  { %58 = vperm.xlu1 %259, %v17_v5   ;;  %53 = vperm.xlu0 %258, %v16_v6   ;;  %v25_v13 = vld [vmem:[%s458_s0 + $0x68] sm:$0xff]  ;;  %v24_v14 = vld [vmem:[%s458_s0 + $0x60] sm:$0xff]  ;;  %v27_v15 = vld [vmem:[%s458_s0 + $0x78] sm:$0xff] }
   0xb   :  { %v26_v16 = vld [vmem:[%s458_s0 + $0x70] sm:$0xff]  ;;  %v386_v17 = vld [vmem:[%s459_s1] ss:$0 sm:$0xff]  ;;  %v393_v22 = vld [vmem:[%s459_s1 + $0x1] ss:$0 sm:$0xff] }
   0xc   :  { %v410_v57 = vld [vmem:[%s459_s1 + $0x2] ss:$0 sm:$0xff]  ;;  %s317_s1 = smov [#allocation2]  }
   0xd   :  { %s240_s18 = sshll.u32 %s317_s1, 4  ;;  %s241_s18 = int_to_ptr.vmem [resolvable:$true] %s240_s18 }
   0xe   :  { %68 = vperm.xlu1 %259, %v19_v7   ;;  %63 = vperm.xlu0 %258, %v18_v8   ;;  %s292_s19 = scalar_lea.vmem %s241_s18, 2048  ;;  %p297_p1 = scmp.lt.s32.totalorder %s241_s18, %s241_s18 }
   0xf   :  { %p293_p0 = scmp.ne.s32.totalorder %s241_s18, %s292_s19  ;;  %p298_p2 = scmp.lt.s32.totalorder %s292_s19, %s292_s19 }
  0x11   :  { %p299_p3 = por %p298_p2, %p297_p1 }
  0x12   :  { %78 = vperm.xlu1 %259, %v21_v9   ;;  %73 = vperm.xlu0 %258, %v20_v10  }
  0x13   :  { %p300_p4 = pnand %p299_p3, %p293_p0 }
  0x16   :  { %88 = vperm.xlu1 %259, %v23_v11   ;;  %83 = vperm.xlu0 %258, %v22_v12  }
  0x1a   :  { %98 = vperm.xlu1 %259, %v25_v13   ;;  %93 = vperm.xlu0 %258, %v24_v14  }
  0x1e   :  { %108 = vperm.xlu1 %259, %v27_v15   ;;  %103 = vperm.xlu0 %258, %v26_v16  }
  0x81   :  { %v44_v18 = vpop.permute.xlu1 %43  ;;  %v34_v19 = vpop.permute.xlu0 %33 }
  0x82   :  { %v117_v20 = vsub.f32 %v44_v18, %v386_v17  ;;  %v115_v21 = vsub.f32 %v34_v19, %v386_v17 }
  0x84   :  { %v133_v23 = vmul.f32 %v117_v20, %v117_v20  ;;  %v131_v24 = vmul.f32 %v115_v21, %v115_v21 }
  0x85   :  { %v49_v25 = vpop.permute.xlu1 %48  ;;  %v39_v26 = vpop.permute.xlu0 %38 }
  0x86   :  { %v153_v27 = vmul.f32 %v393_v22, %v133_v23  ;;  %v151_v28 = vmul.f32 %v393_v22, %v131_v24  ;;  %v118_v29 = vsub.f32 %v49_v25, %v386_v17  ;;  %v116_v30 = vsub.f32 %v39_v26, %v386_v17 }
  0x88   :  { %v171_v31 = vmul.f32 1.442695, %v153_v27  ;;  %v167_v32 = vmul.f32 1.442695, %v151_v28  ;;  %v134_v33 = vmul.f32 %v118_v29, %v118_v29  ;;  %v132_v34 = vmul.f32 %v116_v30, %v116_v30 }
  0x89   :  { %v59_v35 = vpop.permute.xlu1 %58  ;;  %v54_v36 = vpop.permute.xlu0 %53 }
  0x8a   :  { %260 = vpow2.f32 %v171_v31  ;;  %v154_v37 = vmul.f32 %v393_v22, %v134_v33  ;;  %v152_v38 = vmul.f32 %v393_v22, %v132_v34  ;;  %v120_v39 = vsub.f32 %v59_v35, %v386_v17 }
  0x8b   :  { %262 = vpow2.f32 %v167_v32  ;;  %v119_v40 = vsub.f32 %v54_v36, %v386_v17 }
  0x8c   :  { %v173_v41 = vmul.f32 1.442695, %v154_v37  ;;  %v169_v42 = vmul.f32 1.442695, %v152_v38  ;;  %v136_v43 = vmul.f32 %v120_v39, %v120_v39 }
  0x8d   :  { %v135_v44 = vmul.f32 %v119_v40, %v119_v40  ;;  %v69_v45 = vpop.permute.xlu1 %68  ;;  %v64_v46 = vpop.permute.xlu0 %63 }
  0x8e   :  { %264 = vpow2.f32 %v173_v41  ;;  %v156_v47 = vmul.f32 %v393_v22, %v136_v43  ;;  %v122_v48 = vsub.f32 %v69_v45, %v386_v17  ;;  %v121_v49 = vsub.f32 %v64_v46, %v386_v17 }
  0x8f   :  { %266 = vpow2.f32 %v169_v42  ;;  %v155_v50 = vmul.f32 %v393_v22, %v135_v44 }
  0x90   :  { %v177_v51 = vmul.f32 1.442695, %v156_v47  ;;  %v138_v52 = vmul.f32 %v122_v48, %v122_v48  ;;  %v137_v53 = vmul.f32 %v121_v49, %v121_v49 }
  0x91   :  { %v175_v54 = vmul.f32 1.442695, %v155_v50  ;;  %v79_v55 = vpop.permute.xlu1 %78  ;;  %v74_v56 = vpop.permute.xlu0 %73 }
  0x92   :  { %268 = vpow2.f32 %v177_v51  ;;  %v158_v58 = vmul.f32 %v393_v22, %v138_v52  ;;  %v157_v59 = vmul.f32 %v393_v22, %v137_v53  ;;  %v124_v60 = vsub.f32 %v79_v55, %v386_v17 }
  0x93   :  { %270 = vpow2.f32 %v175_v54  ;;  %v123_v61 = vsub.f32 %v74_v56, %v386_v17 }
  0x94   :  { %v261_v62 = vpop.eup %260  ;;  %v181_v63 = vmul.f32 1.442695, %v158_v58  ;;  %v179_v0 = vmul.f32 1.442695, %v157_v59  ;;  %v140_v1 = vmul.f32 %v124_v60, %v124_v60 }
  0x95   :  { %v263_v2 = vpop.eup %262  ;;  %v205_v3 = vmul.f32 %v261_v62, %v410_v57  ;;  %v139_v4 = vmul.f32 %v123_v61, %v123_v61  ;;  %v89_v5 = vpop.permute.xlu1 %88 }
  0x96   :  { %v84_v6 = vpop.permute.xlu0 %83  ;;  %v203_v7 = vmul.f32 %v263_v2, %v410_v57  ;;  %272 = vpow2.f32 %v181_v63  ;;  %v160_v8 = vmul.f32 %v393_v22, %v140_v1  ;;  %v126_v9 = vsub.f32 %v89_v5, %v386_v17 }
  0x97   :  { %221 = vst [vmem:[#allocation2 + $0x10] sm:$0xff] %v205_v3  ;;  %274 = vpow2.f32 %v179_v0  ;;  %v159_v10 = vmul.f32 %v393_v22, %v139_v4  ;;  %v125_v11 = vsub.f32 %v84_v6, %v386_v17 }
  0x98   :  { %v265_v12 = vpop.eup %264  ;;  %219 = vst [vmem:[#allocation2] sm:$0xff] %v203_v7  ;;  %v185_v13 = vmul.f32 1.442695, %v160_v8  ;;  %v142_v14 = vmul.f32 %v126_v9, %v126_v9 }
  0x99   :  { %v267_v15 = vpop.eup %266  ;;  %v206_v16 = vmul.f32 %v265_v12, %v410_v57  ;;  %v183_v18 = vmul.f32 1.442695, %v159_v10  ;;  %v141_v19 = vmul.f32 %v125_v11, %v125_v11  ;;  %v99_v20 = vpop.permute.xlu1 %98 }
  0x9a   :  { %v94_v21 = vpop.permute.xlu0 %93  ;;  %v204_v23 = vmul.f32 %v267_v15, %v410_v57  ;;  %276 = vpow2.f32 %v185_v13  ;;  %v162_v24 = vmul.f32 %v393_v22, %v142_v14  ;;  %v128_v25 = vsub.f32 %v99_v20, %v386_v17 }
  0x9b   :  { %222 = vst [vmem:[#allocation2 + $0x18] sm:$0xff] %v206_v16  ;;  %278 = vpow2.f32 %v183_v18  ;;  %v161_v26 = vmul.f32 %v393_v22, %v141_v19  ;;  %v127_v27 = vsub.f32 %v94_v21, %v386_v17 }
  0x9c   :  { %v269_v28 = vpop.eup %268  ;;  %220 = vst [vmem:[#allocation2 + $0x8] sm:$0xff] %v204_v23  ;;  %v189_v29 = vmul.f32 1.442695, %v162_v24  ;;  %v144_v30 = vmul.f32 %v128_v25, %v128_v25 }
  0x9d   :  { %v271_v31 = vpop.eup %270  ;;  %v208_v32 = vmul.f32 %v269_v28, %v410_v57  ;;  %v187_v33 = vmul.f32 1.442695, %v161_v26  ;;  %v143_v34 = vmul.f32 %v127_v27, %v127_v27  ;;  %v109_v35 = vpop.permute.xlu1 %108 }
  0x9e   :  { %v104_v36 = vpop.permute.xlu0 %103  ;;  %v207_v37 = vmul.f32 %v271_v31, %v410_v57  ;;  %280 = vpow2.f32 %v189_v29  ;;  %v164_v38 = vmul.f32 %v393_v22, %v144_v30  ;;  %v130_v39 = vsub.f32 %v109_v35, %v386_v17 }
  0x9f   :  { %224 = vst [vmem:[#allocation2 + $0x28] sm:$0xff] %v208_v32  ;;  %282 = vpow2.f32 %v187_v33  ;;  %v163_v40 = vmul.f32 %v393_v22, %v143_v34  ;;  %v129_v41 = vsub.f32 %v104_v36, %v386_v17 }
  0xa0   :  { %v273_v42 = vpop.eup %272  ;;  %223 = vst [vmem:[#allocation2 + $0x20] sm:$0xff] %v207_v37  ;;  %v193_v43 = vmul.f32 1.442695, %v164_v38  ;;  %v146_v44 = vmul.f32 %v130_v39, %v130_v39 }
  0xa1   :  { %v275_v45 = vpop.eup %274  ;;  %v210_v46 = vmul.f32 %v273_v42, %v410_v57  ;;  %v191_v47 = vmul.f32 1.442695, %v163_v40  ;;  %v145_v48 = vmul.f32 %v129_v41, %v129_v41 }
  0xa2   :  { %v209_v49 = vmul.f32 %v275_v45, %v410_v57  ;;  %284 = vpow2.f32 %v193_v43  ;;  %v166_v50 = vmul.f32 %v393_v22, %v146_v44 }
  0xa3   :  { %226 = vst [vmem:[#allocation2 + $0x38] sm:$0xff] %v210_v46  ;;  %286 = vpow2.f32 %v191_v47  ;;  %v165_v51 = vmul.f32 %v393_v22, %v145_v48 }
  0xa4   :  { %v277_v52 = vpop.eup %276  ;;  %225 = vst [vmem:[#allocation2 + $0x30] sm:$0xff] %v209_v49  ;;  %v197_v17 = vmul.f32 1.442695, %v166_v50 }
  0xa5   :  { %v279_v53 = vpop.eup %278  ;;  %v212_v54 = vmul.f32 %v277_v52, %v410_v57  ;;  %v195_v55 = vmul.f32 1.442695, %v165_v51 }
  0xa6   :  { %v211_v56 = vmul.f32 %v279_v53, %v410_v57  ;;  %288 = vpow2.f32 %v197_v17 }
  0xa7   :  { %228 = vst [vmem:[#allocation2 + $0x48] sm:$0xff] %v212_v54  ;;  %290 = vpow2.f32 %v195_v55 }
  0xa8   :  { %v281_v58 = vpop.eup %280  ;;  %227 = vst [vmem:[#allocation2 + $0x40] sm:$0xff] %v211_v56 }
  0xa9   :  { %v283_v59 = vpop.eup %282  ;;  %v214_v60 = vmul.f32 %v281_v58, %v410_v57 }
  0xaa   :  { %v213_v61 = vmul.f32 %v283_v59, %v410_v57 }
  0xab   :  { %230 = vst [vmem:[#allocation2 + $0x58] sm:$0xff] %v214_v60 }
  0xac   :  { %v285_v22 = vpop.eup %284  ;;  %229 = vst [vmem:[#allocation2 + $0x50] sm:$0xff] %v213_v61 }
  0xad   :  { %v287_v62 = vpop.eup %286  ;;  %v216_v63 = vmul.f32 %v285_v22, %v410_v57 }
  0xae   :  { %v215_v0 = vmul.f32 %v287_v62, %v410_v57 }
  0xaf   :  { %232 = vst [vmem:[#allocation2 + $0x68] sm:$0xff] %v216_v63 }
  0xb0   :  { %v289_v1 = vpop.eup %288  ;;  %231 = vst [vmem:[#allocation2 + $0x60] sm:$0xff] %v215_v0 }
  0xb1   :  { %v291_v2 = vpop.eup %290  ;;  %v218_v3 = vmul.f32 %v289_v1, %v410_v57 }
  0xb2   :  { %v217_v4 = vmul.f32 %v291_v2, %v410_v57 }
  0xb3   :  { %234 = vst [vmem:[#allocation2 + $0x78] sm:$0xff] %v218_v3 }
  0xb4   :  { %233 = vst [vmem:[#allocation2 + $0x70] sm:$0xff] %v217_v4 }
  0xb5   :  { %303 = shalt.err (!%p300_p4)
}
  0xb6   :  { %s304_s22 = scalar_lea.hbm %s460_s2, 2048 }
  0xb7   :  { %p305_p5 = scmp.ne.s32.totalorder %s460_s2, %s304_s22  ;;  %p308_p6 = scmp.lt.u32.totalorder %s304_s22, %s460_s2 }
  0xb9   :  { %p310_p7 = pnand %p308_p6, %p305_p5 }
  0xbb   :  { %313 = shalt.err (!%p310_p7)
}
  0xbc   :  { %s318_s27 = smov 128   ;;  %s319_s28 = smov 8  }
  0xbd   :  { %246 = dma.vmem_to_hbm [thread:$0]  %s241_s18, 2048, %s460_s2, [#allocation3], %s318_s27, %s318_s27, %s319_s28  }
  0xbe   :  { %314 = dma.done.wait [#allocation3], 2048  }
  0xbf   :  { %315 = vsyncadd [#allocation3], 4294965248 }
  0xc0   :  { %250 = vsyncpa [#allocation3], 1 }

</bundles_post_ra>
